<compile_context>
chip_gen: v6e
topology: v6e:2x2x1
jax: 0.10.0
libtpu: 0.0.40
codegen_flags: <defaults>
</compile_context>

<pallas_src>
import functools

import jax
import jax.numpy as jnp
from jax import lax
from jax.experimental import pallas as pl
from jax.experimental.pallas import tpu as pltpu

LANES = 128          # vreg lane width
SUBLANES = 8         # vreg sublane count (f32)
MAX_TILE_ROWS = 256  # 256 * 128 = 32768 elements per field per tile (~0.6 MB/input block)
NUM_SLICES = 2       # megacore split for v7x (2 TCs); one extra serial step elsewhere


def _round_up(x, m):
    return (x + m - 1) // m * m


def _iou_kernel(p_ref, t_ref, o_ref, acc_ref, *, n, bce_coeff, tile_rows,
                tiles_per_slice):
    c = pl.program_id(0)   # "parallel" slice (megacore)
    i = pl.program_id(1)   # "arbitrary" reduction step within the slice

    @pl.when(i == 0)
    def _():
        acc_ref[...] = jnp.zeros_like(acc_ref)

    p = p_ref[...]   # (5, tile_rows, 128) f32, fields on the leading (major) axis
    t = t_ref[...]

    # ---- per-example IoU loss on sigmoid(pred box) vs target box ----
    # One dense sigmoid over all 4 box fields (single EUP pass on packed vregs).
    pb = jax.nn.sigmoid(p[1:5])                    # (4, tile_rows, 128)
    p0, p1, p2, p3 = pb[0], pb[1], pb[2], pb[3]    # dense (tile_rows, 128) slabs
    t0, t1, t2, t3 = t[1], t[2], t[3], t[4]

    pred_area = jnp.abs(p2 - p0) * jnp.abs(p3 - p1)
    target_area = (t2 - t0) * (t3 - t1)

    x1 = jnp.maximum(jnp.minimum(p2, p0), t0)
    x2 = jnp.minimum(jnp.maximum(p2, p0), t2)
    y1 = jnp.maximum(jnp.minimum(p1, p3), t1)
    y2 = jnp.minimum(jnp.maximum(p1, p3), t3)
    overlap = (x2 - x1) * (y2 - y1)
    denom = target_area + pred_area - overlap
    # Faithful to the PyTorch code: divide everywhere, discard where overlap < 0.
    iou = jnp.where(overlap < 0.0, 0.0, overlap / denom)
    iou_term = 1.0 - iou                           # (tile_rows, 128)

    # ---- BCE with logits on field 0 (dense block: one exp + one log / element) ----
    x = p[0]
    y = t[0]
    bce_term = jnp.maximum(x, 0.0) - x * y + jnp.log(1.0 + jnp.exp(-jnp.abs(x)))

    # ---- mask out padded lanes (global element index >= n) ----
    tile_idx = c * tiles_per_slice + i
    row = lax.broadcasted_iota(jnp.int32, (tile_rows, LANES), 0)
    lane = lax.broadcasted_iota(jnp.int32, (tile_rows, LANES), 1)
    gidx = (tile_idx * tile_rows + row) * LANES + lane
    valid = gidx < n

    per_elem = jnp.where(valid, bce_coeff * bce_term + iou_term, 0.0)
    tile_sum = jnp.sum(per_elem, axis=-1, keepdims=True)   # (tile_rows, 1) lane reduce (XLU)
    tile_sum = jnp.sum(tile_sum, axis=0, keepdims=True)    # (1, 1) sublane reduce
    acc_ref[...] = acc_ref[...] + tile_sum

    @pl.when(i == pl.num_programs(1) - 1)
    def _():
        # Scalar output, written once per slice (already normalized by n).
        o_ref[...] = jnp.reshape(acc_ref[...] * (1.0 / n), (1, 1, 1))


def _pack_fields(x, rows_padded):
    """(N, 5) -> (5, rows_padded, 128) f32, zero padded; element j -> (j//128, j%128)."""
    n = x.shape[0]
    xt = jnp.transpose(x.astype(jnp.float32))                    # (5, N)
    xt = jnp.pad(xt, ((0, 0), (0, rows_padded * LANES - n)))
    return xt.reshape(5, rows_padded, LANES)


@functools.partial(jax.jit, static_argnames=("bce_coeff",))
def iou_loss_pallas(preds, target, bce_coeff=0.2):
    assert preds.shape == target.shape and preds.shape[1] == 5
    n = preds.shape[0]

    # Tiling: dense 128-lane layout, tile_rows a multiple of 8 (sublanes),
    # tiles split evenly across NUM_SLICES parallel (megacore) slices.
    rows_needed = pl.cdiv(n, LANES)
    tile_rows = min(MAX_TILE_ROWS, _round_up(rows_needed, SUBLANES))
    tiles_total = _round_up(pl.cdiv(rows_needed, tile_rows), NUM_SLICES)
    tiles_per_slice = tiles_total // NUM_SLICES
    rows_padded = tiles_total * tile_rows

    # Layout change (transpose/pad/reshape) stays inside this jit region so XLA
    # fuses it with adjacent ops instead of materializing an extra HBM pass.
    p_pack = _pack_fields(preds, rows_padded)
    t_pack = _pack_fields(target, rows_padded)

    kernel = functools.partial(
        _iou_kernel, n=n, bce_coeff=float(bce_coeff),
        tile_rows=tile_rows, tiles_per_slice=tiles_per_slice)

    partials = pl.pallas_call(
        kernel,
        out_shape=jax.ShapeDtypeStruct((NUM_SLICES, 1, 1), jnp.float32),
        grid=(NUM_SLICES, tiles_per_slice),
        in_specs=[
            pl.BlockSpec((5, tile_rows, LANES),
                         lambda c, i: (0, c * tiles_per_slice + i, 0)),
            pl.BlockSpec((5, tile_rows, LANES),
                         lambda c, i: (0, c * tiles_per_slice + i, 0)),
        ],
        out_specs=pl.BlockSpec((1, 1, 1), lambda c, i: (c, 0, 0)),
        scratch_shapes=[pltpu.VMEM((1, 1), jnp.float32)],
        compiler_params=pltpu.CompilerParams(
            dimension_semantics=("parallel", "arbitrary")),
    )(p_pack, t_pack)

    # Each slice's partial sum is already divided by n; total loss = their sum.
    return jnp.sum(partials)


def iou_loss_reference(preds, target, bce_coeff=0.2):
    """Pure-JAX reference mirroring the PyTorch module."""
    preds = jnp.asarray(preds, jnp.float32)
    target = jnp.asarray(target, jnp.float32)
    n = preds.shape[0]

    pb = jax.nn.sigmoid(preds[:, 1:5])
    tb = target[:, 1:5]
    p0, p1, p2, p3 = pb[:, 0], pb[:, 1], pb[:, 2], pb[:, 3]
    t0, t1, t2, t3 = tb[:, 0], tb[:, 1], tb[:, 2], tb[:, 3]

    pred_area = jnp.abs(p2 - p0) * jnp.abs(p3 - p1)
    target_area = (t2 - t0) * (t3 - t1)
    x1 = jnp.maximum(jnp.minimum(p2, p0), t0)
    x2 = jnp.minimum(jnp.maximum(p2, p0), t2)
    y1 = jnp.maximum(jnp.minimum(p1, p3), t1)
    y2 = jnp.minimum(jnp.maximum(p1, p3), t3)
    overlap = (x2 - x1) * (y2 - y1)
    iou = jnp.where(overlap < 0.0, 0.0,
                    overlap / (target_area + pred_area - overlap))
    iou_loss = jnp.sum(1.0 - iou) / n

    x = preds[:, 0]
    y = target[:, 0]
    bce = jnp.mean(jnp.maximum(x, 0.0) - x * y + jnp.log1p(jnp.exp(-jnp.abs(x))))
    return bce_coeff * bce + iou_loss


if __name__ == "__main__":
    key = jax.random.PRNGKey(0)
    k1, k2, k3 = jax.random.split(key, 3)

    # ---- test 1: small batch (same construction as the module implies) ----
    N = 8
    preds = jax.random.normal(k1, (N, 5), dtype=jnp.float32)
    obj = jax.random.bernoulli(k2, 0.5, (N, 1)).astype(jnp.float32)
    boxes = jax.random.uniform(k3, (N, 4), dtype=jnp.float32)
    target = jnp.concatenate([obj, boxes], axis=1)

    out = jax.block_until_ready(iou_loss_pallas(preds, target, bce_coeff=0.2))
    ref = iou_loss_reference(preds, target, bce_coeff=0.2)
    assert jnp.allclose(out, ref, atol=1e-5, rtol=1e-5), (out, ref)

    # ---- test 2: N not a multiple of 128 -> exercises tail masking ----
    N2 = 300
    k4, k5, k6, k7 = jax.random.split(jax.random.PRNGKey(1), 4)
    preds2 = jax.random.normal(k4, (N2, 5), dtype=jnp.float32)
    obj2 = jax.random.bernoulli(k5, 0.5, (N2, 1)).astype(jnp.float32)
    xy_min = jax.random.uniform(k6, (N2, 2), minval=0.0, maxval=0.4)
    wh = jax.random.uniform(k7, (N2, 2), minval=0.1, maxval=0.5)
    target2 = jnp.concatenate([obj2, xy_min, xy_min + wh], axis=1).astype(jnp.float32)

    out2 = jax.block_until_ready(iou_loss_pallas(preds2, target2, bce_coeff=0.2))
    ref2 = iou_loss_reference(preds2, target2, bce_coeff=0.2)
    assert jnp.allclose(out2, ref2, atol=1e-5, rtol=1e-5), (out2, ref2)

    print("KERNEL_OK")
</pallas_src>

<mosaic_0001>
module attributes {stable_mosaic.version = 11 : i64} {
  func.func @_iou_kernel(%arg0: i32, %arg1: i32, %arg2: memref<5x8x128xf32, #tpu.memory_space<vmem>>, %arg3: memref<5x8x128xf32, #tpu.memory_space<vmem>>, %arg4: memref<1x1x1xf32, #tpu.memory_space<vmem>>, %arg5: memref<1x1xf32, #tpu.memory_space<vmem>>) attributes {dimension_semantics = [#tpu.dimension_semantics<parallel>, #tpu.dimension_semantics<arbitrary>], iteration_bounds = array<i64: 2, 1>, scalar_prefetch = 0 : i64, scratch_operands = 1 : i64, tpu.core_type = #tpu.core_type<tc>, window_params = [{transform_indices = @transform_0, window_bounds = array<i64: 5, 8, 128>}, {transform_indices = @transform_1, window_bounds = array<i64: 5, 8, 128>}, {transform_indices = @transform_2, window_bounds = array<i64: 1, 1, 1>}]} {
    %c0_i32 = arith.constant 0 : i32
    %0 = arith.cmpi eq, %arg1, %c0_i32 : i32
    %1 = arith.extui %0 : i1 to i32
    %c0_i32_0 = arith.constant 0 : i32
    %2 = arith.cmpi ne, %1, %c0_i32_0 : i32
    scf.if %2 {
      %cst_23 = arith.constant 0.000000e+00 : f32
      %98 = vector.broadcast %cst_23 : f32 to vector<1x1xf32>
      %c0_24 = arith.constant 0 : index
      %c0_25 = arith.constant 0 : index
      %99 = vector.load %arg5[%c0_24, %c0_25] : memref<1x1xf32, #tpu.memory_space<vmem>>, vector<1x1xf32>
      tpu.vector_store %arg5[%c0_24, %c0_25], %98 {strides = array<i32>} : memref<1x1xf32, #tpu.memory_space<vmem>>, vector<1x1xf32>,
    } else {
    }
    %c0 = arith.constant 0 : index
    %c0_1 = arith.constant 0 : index
    %c0_2 = arith.constant 0 : index
    %3 = vector.load %arg2[%c0, %c0_1, %c0_2] : memref<5x8x128xf32, #tpu.memory_space<vmem>>, vector<5x8x128xf32>
    %c0_3 = arith.constant 0 : index
    %c0_4 = arith.constant 0 : index
    %c0_5 = arith.constant 0 : index
    %4 = vector.load %arg3[%c0_3, %c0_4, %c0_5] : memref<5x8x128xf32, #tpu.memory_space<vmem>>, vector<5x8x128xf32>
    %5 = vector.extract_strided_slice %3 {offsets = [1, 0, 0], sizes = [4, 8, 128], strides = [1, 1, 1]} : vector<5x8x128xf32> to vector<4x8x128xf32>
    %6 = arith.negf %5 : vector<4x8x128xf32>
    %7 = math.exp %6 : vector<4x8x128xf32>
    %cst = arith.constant 1.000000e+00 : f32
    %8 = vector.broadcast %cst : f32 to vector<4x8x128xf32>
    %9 = arith.addf %8, %7 : vector<4x8x128xf32>
    %10 = arith.divf %8, %9 : vector<4x8x128xf32>
    %11 = vector.extract_strided_slice %10 {offsets = [0, 0, 0], sizes = [1, 8, 128], strides = [1, 1, 1]} : vector<4x8x128xf32> to vector<1x8x128xf32>
    %12 = vector.shape_cast %11 : vector<1x8x128xf32> to vector<8x128xf32>
    %13 = vector.extract_strided_slice %10 {offsets = [1, 0, 0], sizes = [1, 8, 128], strides = [1, 1, 1]} : vector<4x8x128xf32> to vector<1x8x128xf32>
    %14 = vector.shape_cast %13 : vector<1x8x128xf32> to vector<8x128xf32>
    %15 = vector.extract_strided_slice %10 {offsets = [2, 0, 0], sizes = [1, 8, 128], strides = [1, 1, 1]} : vector<4x8x128xf32> to vector<1x8x128xf32>
    %16 = vector.shape_cast %15 : vector<1x8x128xf32> to vector<8x128xf32>
    %17 = vector.extract_strided_slice %10 {offsets = [3, 0, 0], sizes = [1, 8, 128], strides = [1, 1, 1]} : vector<4x8x128xf32> to vector<1x8x128xf32>
    %18 = vector.shape_cast %17 : vector<1x8x128xf32> to vector<8x128xf32>
    %19 = vector.extract_strided_slice %4 {offsets = [1, 0, 0], sizes = [1, 8, 128], strides = [1, 1, 1]} : vector<5x8x128xf32> to vector<1x8x128xf32>
    %20 = vector.shape_cast %19 : vector<1x8x128xf32> to vector<8x128xf32>
    %21 = vector.extract_strided_slice %4 {offsets = [2, 0, 0], sizes = [1, 8, 128], strides = [1, 1, 1]} : vector<5x8x128xf32> to vector<1x8x128xf32>
    %22 = vector.shape_cast %21 : vector<1x8x128xf32> to vector<8x128xf32>
    %23 = vector.extract_strided_slice %4 {offsets = [3, 0, 0], sizes = [1, 8, 128], strides = [1, 1, 1]} : vector<5x8x128xf32> to vector<1x8x128xf32>
    %24 = vector.shape_cast %23 : vector<1x8x128xf32> to vector<8x128xf32>
    %25 = vector.extract_strided_slice %4 {offsets = [4, 0, 0], sizes = [1, 8, 128], strides = [1, 1, 1]} : vector<5x8x128xf32> to vector<1x8x128xf32>
    %26 = vector.shape_cast %25 : vector<1x8x128xf32> to vector<8x128xf32>
    %27 = arith.subf %16, %12 : vector<8x128xf32>
    %28 = math.absf %27 : vector<8x128xf32>
    %29 = arith.subf %18, %14 : vector<8x128xf32>
    %30 = math.absf %29 : vector<8x128xf32>
    %31 = arith.mulf %28, %30 : vector<8x128xf32>
    %32 = arith.subf %24, %20 : vector<8x128xf32>
    %33 = arith.subf %26, %22 : vector<8x128xf32>
    %34 = arith.mulf %32, %33 : vector<8x128xf32>
    %35 = arith.minimumf %16, %12 : vector<8x128xf32>
    %36 = arith.maximumf %35, %20 : vector<8x128xf32>
    %37 = arith.maximumf %16, %12 : vector<8x128xf32>
    %38 = arith.minimumf %37, %24 : vector<8x128xf32>
    %39 = arith.minimumf %14, %18 : vector<8x128xf32>
    %40 = arith.maximumf %39, %22 : vector<8x128xf32>
    %41 = arith.maximumf %14, %18 : vector<8x128xf32>
    %42 = arith.minimumf %41, %26 : vector<8x128xf32>
    %43 = arith.subf %38, %36 : vector<8x128xf32>
    %44 = arith.subf %42, %40 : vector<8x128xf32>
    %45 = arith.mulf %43, %44 : vector<8x128xf32>
    %46 = arith.addf %34, %31 : vector<8x128xf32>
    %47 = arith.subf %46, %45 : vector<8x128xf32>
    %cst_6 = arith.constant 0.000000e+00 : f32
    %48 = vector.broadcast %cst_6 : f32 to vector<8x128xf32>
    %49 = arith.cmpf olt, %45, %48 : vector<8x128xf32>
    %50 = arith.divf %45, %47 : vector<8x128xf32>
    %cst_7 = arith.constant 0.000000e+00 : f32
    %51 = vector.broadcast %cst_7 : f32 to vector<8x128xf32>
    %52 = arith.select %49, %51, %50 : vector<8x128xi1>, vector<8x128xf32>
    %cst_8 = arith.constant 1.000000e+00 : f32
    %53 = vector.broadcast %cst_8 : f32 to vector<8x128xf32>
    %54 = arith.subf %53, %52 : vector<8x128xf32>
    %55 = vector.extract_strided_slice %3 {offsets = [0, 0, 0], sizes = [1, 8, 128], strides = [1, 1, 1]} : vector<5x8x128xf32> to vector<1x8x128xf32>
    %56 = vector.shape_cast %55 : vector<1x8x128xf32> to vector<8x128xf32>
    %57 = vector.extract_strided_slice %4 {offsets = [0, 0, 0], sizes = [1, 8, 128], strides = [1, 1, 1]} : vector<5x8x128xf32> to vector<1x8x128xf32>
    %58 = vector.shape_cast %57 : vector<1x8x128xf32> to vector<8x128xf32>
    %cst_9 = arith.constant 0.000000e+00 : f32
    %59 = vector.broadcast %cst_9 : f32 to vector<8x128xf32>
    %60 = arith.maximumf %56, %59 : vector<8x128xf32>
    %61 = arith.mulf %56, %58 : vector<8x128xf32>
    %62 = arith.subf %60, %61 : vector<8x128xf32>
    %63 = math.absf %56 : vector<8x128xf32>
    %cst_10 = arith.constant 0.000000e+00 : f32
    %64 = vector.broadcast %cst_10 : f32 to vector<8x128xf32>
    %65 = arith.subf %64, %63 : vector<8x128xf32>
    %66 = math.exp %65 : vector<8x128xf32>
    %cst_11 = arith.constant 1.000000e+00 : f32
    %67 = vector.broadcast %cst_11 : f32 to vector<8x128xf32>
    %68 = arith.addf %67, %66 : vector<8x128xf32>
    %69 = math.log %68 : vector<8x128xf32>
    %70 = arith.addf %62, %69 : vector<8x128xf32>
    %c1_i32 = arith.constant 1 : i32
    %71 = arith.muli %arg0, %c1_i32 : i32
    %72 = arith.addi %71, %arg1 : i32
    %73 = tpu.iota {dimensions = array<i32: 0>} : vector<8x128xi32>
    %74 = tpu.iota {dimensions = array<i32: 1>} : vector<8x128xi32>
    %c8_i32 = arith.constant 8 : i32
    %75 = arith.muli %72, %c8_i32 : i32
    %76 = vector.broadcast %75 : i32 to vector<8x128xi32>
    %77 = arith.addi %76, %73 : vector<8x128xi32>
    %c128_i32 = arith.constant 128 : i32
    %78 = vector.broadcast %c128_i32 : i32 to vector<8x128xi32>
    %79 = arith.muli %77, %78 : vector<8x128xi32>
    %80 = arith.addi %79, %74 : vector<8x128xi32>
    %c8_i32_12 = arith.constant 8 : i32
    %81 = vector.broadcast %c8_i32_12 : i32 to vector<8x128xi32>
    %82 = arith.cmpi slt, %80, %81 : vector<8x128xi32>
    %cst_13 = arith.constant 2.000000e-01 : f32
    %83 = vector.broadcast %cst_13 : f32 to vector<8x128xf32>
    %84 = arith.mulf %83, %70 : vector<8x128xf32>
    %85 = arith.addf %84, %54 : vector<8x128xf32>
    %cst_14 = arith.constant 0.000000e+00 : f32
    %86 = vector.broadcast %cst_14 : f32 to vector<8x128xf32>
    %87 = arith.select %82, %85, %86 : vector<8x128xi1>, vector<8x128xf32>
    %cst_15 = arith.constant dense<0.000000e+00> : vector<8xf32>
    %88 = vector.multi_reduction <add>, %87, %cst_15 [1] : vector<8x128xf32> to vector<8xf32>
    %89 = vector.shape_cast %88 : vector<8xf32> to vector<8x1xf32>
    %cst_16 = arith.constant dense<0.000000e+00> : vector<1xf32>
    %90 = vector.multi_reduction <add>, %89, %cst_16 [0] : vector<8x1xf32> to vector<1xf32>
    %91 = vector.shape_cast %90 : vector<1xf32> to vector<1x1xf32>
    %c0_17 = arith.constant 0 : index
    %c0_18 = arith.constant 0 : index
    %92 = vector.load %arg5[%c0_17, %c0_18] : memref<1x1xf32, #tpu.memory_space<vmem>>, vector<1x1xf32>
    %93 = arith.addf %92, %91 : vector<1x1xf32>
    %c0_19 = arith.constant 0 : index
    %c0_20 = arith.constant 0 : index
    %94 = vector.load %arg5[%c0_19, %c0_20] : memref<1x1xf32, #tpu.memory_space<vmem>>, vector<1x1xf32>
    tpu.vector_store %arg5[%c0_19, %c0_20], %93 {strides = array<i32>} : memref<1x1xf32, #tpu.memory_space<vmem>>, vector<1x1xf32>,
    %c0_i32_21 = arith.constant 0 : i32
    %95 = arith.cmpi eq, %arg1, %c0_i32_21 : i32
    %96 = arith.extui %95 : i1 to i32
    %c0_i32_22 = arith.constant 0 : i32
    %97 = arith.cmpi ne, %96, %c0_i32_22 : i32
    scf.if %97 {
      %c0_23 = arith.constant 0 : index
      %c0_24 = arith.constant 0 : index
      %98 = vector.load %arg5[%c0_23, %c0_24] : memref<1x1xf32, #tpu.memory_space<vmem>>, vector<1x1xf32>
      %cst_25 = arith.constant 1.250000e-01 : f32
      %99 = vector.broadcast %cst_25 : f32 to vector<1x1xf32>
      %100 = arith.mulf %98, %99 : vector<1x1xf32>
      %101 = vector.shape_cast %100 : vector<1x1xf32> to vector<1x1x1xf32>
      %c0_26 = arith.constant 0 : index
      %c0_27 = arith.constant 0 : index
      %c0_28 = arith.constant 0 : index
      %102 = vector.load %arg4[%c0_26, %c0_27, %c0_28] : memref<1x1x1xf32, #tpu.memory_space<vmem>>, vector<1x1x1xf32>
      tpu.vector_store %arg4[%c0_26, %c0_27, %c0_28], %101 {strides = array<i32>} : memref<1x1x1xf32, #tpu.memory_space<vmem>>, vector<1x1x1xf32>,
    } else {
    }
    return
  }
  func.func @transform_0(%arg0: i32, %arg1: i32) -> (i32, i32, i32) {
    %c1_i32 = arith.constant 1 : i32
    %0 = arith.muli %arg0, %c1_i32 : i32
    %1 = arith.addi %0, %arg1 : i32
    %c0_i32 = arith.constant 0 : i32
    %c0_i32_0 = arith.constant 0 : i32
    %c0_i32_1 = arith.constant 0 : i32
    return %c0_i32, %1, %c0_i32_0 : i32, i32, i32
  }
  func.func @transform_1(%arg0: i32, %arg1: i32) -> (i32, i32, i32) {
    %c1_i32 = arith.constant 1 : i32
    %0 = arith.muli %arg0, %c1_i32 : i32
    %1 = arith.addi %0, %arg1 : i32
    %c0_i32 = arith.constant 0 : i32
    %c0_i32_0 = arith.constant 0 : i32
    %c0_i32_1 = arith.constant 0 : i32
    return %c0_i32, %1, %c0_i32_0 : i32, i32, i32
  }
  func.func @transform_2(%arg0: i32, %arg1: i32) -> (i32, i32, i32) {
    %c0_i32 = arith.constant 0 : i32
    %c0_i32_0 = arith.constant 0 : i32
    %c0_i32_1 = arith.constant 0 : i32
    return %arg0, %c0_i32, %c0_i32_0 : i32, i32, i32
  }
}

</mosaic_0001>

<bundles_post_ra>
// kernel: iou_loss_pallas.1
= control target key start
LH: loop header
LB: loop body
LE: loop exit
PB: predicated region body
PF: predicated region fallthrough
CT: control target
= control target key end

     0   :  { %s608_s9 = smov 0   ;;  %s610_s10 = smov 0   ;;  %s707_s0 = inlined_call_operand.vmem [shape: f32[5,16,128], index: 0, kind: input, shape index: {}]   ;;  %s708_s1 = inlined_call_operand.vmem [shape: f32[5,16,128], index: 1, kind: input, shape index: {}]   ;;  %s709_s2 = inlined_call_operand.vmem [shape: f32[2,1,1], index: 2, kind: output, shape index: {}]  }
   0x1   :  { %s612_s11 = smov 0   ;;  %s614_s12 = smov 0  }
   0x2   :  { %s616_s13 = smov 0  }
   0x3 LB: > { %s24_s14 = sadd.s32 1, %s586_s12  ;;  %p40_p1 = scmp.ne.s32.totalorder %s578_s10, %s574_s9  ;;  %s590_s13 = sphi %s616_s13, %s12_s13   ;;  %s586_s12 = sphi %s614_s12, %s714_s12   ;;  %s582_s11 = sphi %s612_s11, %s713_s11   ;;  %s578_s10 = sphi %s610_s10, %s712_s10   ;;  %s574_s9 = sphi %s608_s9, %s711_s9  }
   0x4   : > { %p26_p0 = scmp.ge.s32.totalorder %s24_s14, 2  ;;  %p41_p2 = scmp.eq.s32.totalorder %s590_s13, 0 }
   0x5   : > { %s33_s17 = sadd.s32 1, %s578_s10  ;;  %p475_p5 = scmp.ge.s32.totalorder %s590_s13, 2 }
   0x6   : > { %s716_s14 = smov (%p26_p0, %s24_s14), 0  ;;  %p639_p3 = por %p41_p2, %p40_p1 }
   0x7   : > { %s30_s16 = ssub.s32 %s586_s12, %s716_s14  ;;  %120 = sbr.rel (%p475_p5) target bundleno = 26 (0x1a), region = 16 }
   0x8   : > { %p31_p4 = scmp.eq.s32.totalorder %s30_s16, 0 }
   0xa   : > { %s647_s18 = scalar_select %p31_p4, %s578_s10, %s33_s17  }
   0xc   : > { %123 = sbr.rel (!%p639_p3) target bundleno = 19 (0x13), region = 20  ;;  %s125_s19 = sand.u32 (%p639_p3), 1, %s578_s10  }
   0xd   : > { %s476_s20 = sshll.u32 (%p639_p3), %s586_s12, 3  ;;  %s486_s21 = smul.u32 (%p639_p3), 40, %s125_s19 }
   0xe   : > { %s130_s24 = scalar_lea.vmem (%p639_p3), %s707_s0, %s476_s20 }
   0xf   : > { %v167_v0 = vld [vmem:[%s130_s24] sm:$0xff] (%p639_p3)  ;;  %v169_v1 = vld [vmem:[%s130_s24 + $0x10] sm:$0xff] (%p639_p3)  ;;  %s127_s25 = scalar_lea.vmem (%p639_p3), [#allocation3], %s486_s21 }
  0x10   : > { %v171_v2 = vld [vmem:[%s130_s24 + $0x20] sm:$0xff] (%p639_p3)  ;;  %v173_v3 = vld [vmem:[%s130_s24 + $0x30] sm:$0xff] (%p639_p3)  ;;  %168 = vst [vmem:[%s127_s25] sm:$0xff] (%p639_p3), %v167_v0  ;;  %170 = vst [vmem:[%s127_s25 + $0x8] sm:$0xff] (%p639_p3), %v169_v1 }
  0x11   : > { %v175_v4 = vld [vmem:[%s130_s24 + $0x40] sm:$0xff]  ;;  %172 = vst [vmem:[%s127_s25 + $0x10] sm:$0xff] %v171_v2  ;;  %174 = vst [vmem:[%s127_s25 + $0x18] sm:$0xff] %v173_v3 }
  0x12   : > { %176 = vst [vmem:[%s127_s25 + $0x20] sm:$0xff] %v175_v4 }
  0x13 PF: > { %182 = sbr.rel (!%p639_p3) target bundleno = 26 (0x1a), region = 58  ;;  %s184_s26 = sand.u32 (%p639_p3), 1, %s578_s10  }
  0x14   : > { %s477_s27 = sshll.u32 (%p639_p3), %s586_s12, 3  ;;  %s487_s28 = smul.u32 (%p639_p3), 40, %s184_s26 }
  0x15   : > { %s189_s3 = scalar_lea.vmem (%p639_p3), %s708_s1, %s477_s27 }
  0x16   : > { %v226_v5 = vld [vmem:[%s189_s3] sm:$0xff] (%p639_p3)  ;;  %v228_v6 = vld [vmem:[%s189_s3 + $0x10] sm:$0xff] (%p639_p3)  ;;  %s186_s4 = scalar_lea.vmem (%p639_p3), [#allocation4], %s487_s28 }
  0x17   : > { %v230_v7 = vld [vmem:[%s189_s3 + $0x20] sm:$0xff] (%p639_p3)  ;;  %v232_v8 = vld [vmem:[%s189_s3 + $0x30] sm:$0xff] (%p639_p3)  ;;  %227 = vst [vmem:[%s186_s4] sm:$0xff] (%p639_p3), %v226_v5  ;;  %229 = vst [vmem:[%s186_s4 + $0x8] sm:$0xff] (%p639_p3), %v228_v6 }
  0x18   : > { %v234_v9 = vld [vmem:[%s189_s3 + $0x40] sm:$0xff]  ;;  %231 = vst [vmem:[%s186_s4 + $0x10] sm:$0xff] %v230_v7  ;;  %233 = vst [vmem:[%s186_s4 + $0x18] sm:$0xff] %v232_v8 }
  0x19   : > { %235 = vst [vmem:[%s186_s4 + $0x20] sm:$0xff] %v234_v9 }
  0x1a PF: > { %p478_p6 = scmp.ge.s32.totalorder %s590_s13, 1  ;;  %p240_p7 = scmp.lt.s32.totalorder %s590_s13, 3 }
  0x1c   : > { %p241_p8 = pnand %p478_p6, %p240_p7 }
  0x1d   : > { %s247_s5 = sand.u32 (!%p241_p8), 1, %s574_s9   ;;  %s483_s9 = sshll.u32 (!%p241_p8), %s582_s11, 3 }
  0x1e   : > { %244 = sbr.rel (%p241_p8) target bundleno = 266 (0x10a), region = 96  ;;  %p279_p9 = scmp.lt.s32.totalorder (!%p241_p8), %s582_s11, 1 }
  0x1f   : > { %s667_s6 = smul.u32 (!%p241_p8), 40, %s247_s5 }
  0x21   : > { %s249_s7 = scalar_lea.vmem (!%p241_p8), [#allocation3], %s667_s6  ;;  %s675_s8 = scalar_lea.vmem (!%p241_p8), [#allocation4], %s667_s6 }
  0x23   : > { %vm286_vm0 = vcmask 0   ;;  %v592_v10 = vmov 0.0   ;;  %v289_v11 = vld [vmem:[%s249_s7 + $0x8] sm:$0xff]  ;;  %v290_v12 = vld [vmem:[%s249_s7 + $0x10] sm:$0xff]  ;;  %v291_v13 = vld [vmem:[%s249_s7 + $0x18] sm:$0xff]  ;;  %v360_v62 = vlaneseq  ;;  %v365_v3 = vstv %s483_s9  ;;  %s718_s11 = smov (!%p279_p9, %s582_s11), 1 }
  0x24   : > { %287 = vst.msk [vmem:[#allocation2] sm:$0x1] %vm286_vm0, %v592_v10  ;;  %v292_v14 = vld [vmem:[%s249_s7 + $0x20] sm:$0xff]  ;;  %v479_v15 = vmul.f32 -1.442695, %v289_v11  ;;  %v294_v32 = vld [vmem:[%s675_s8 + $0x8] sm:$0xff]  ;;  %s281_s17 = scalar_lea.vmem %s709_s2, %s718_s11 }
  0x25   : > { %v671_v16 = vld [vmem:[%s249_s7] sm:$0xff]  ;;  %v480_v17 = vmul.f32 -1.442695, %v290_v12  ;;  %v481_v18 = vmul.f32 -1.442695, %v291_v13  ;;  %v296_v34 = vld [vmem:[%s675_s8 + $0x18] sm:$0xff] }
  0x26   : > { %530 = vpow2.f32 %v479_v15  ;;  %v482_v19 = vmul.f32 -1.442695, %v292_v14  ;;  %v351_v20 = vand.u32 2147483647, %v671_v16  ;;  %v295_v33 = vld [vmem:[%s675_s8 + $0x10] sm:$0xff]  ;;  %v297_v35 = vld [vmem:[%s675_s8 + $0x20] sm:$0xff]  ;;  %v327_v40 = vsub.f32 %v296_v34, %v294_v32 }
  0x27   : > { %532 = vpow2.f32 %v480_v17  ;;  %v328_v41 = vsub.f32 %v297_v35, %v295_v33  ;;  %v293_v63 = vld [vmem:[%s675_s8] sm:$0xff]  ;;  %v361_v0 = vshrl.u32 %v360_v62, 7  ;;  %v348_v1 = vmax.f32 %v671_v16, 0.0 }
  0x28   : > { %534 = vpow2.f32 %v481_v18  ;;  %v352_v21 = vsub.f32 0.0, %v351_v20  ;;  %v349_v2 = vmul.f32 %v293_v63, %v671_v16  ;;  %v363_v8 = vand.u32 127, %v360_v62 }
  0x29   : > { %536 = vpow2.f32 %v482_v19  ;;  %v329_v53 = vmul.f32 %v328_v41, %v327_v40  ;;  %v366_v5 = vadd.s32 %v365_v3, %v361_v0 }
  0x2a   : > { %v353_v22 = vmul.f32 1.442695, %v352_v21  ;;  %v350_v6 = vsub.f32 %v348_v1, %v349_v2 }
  0x2b   : > { %v367_v9 = vmul.u32 128, %v366_v5 }
  0x2c   : > { %538 = vpow2.f32 %v353_v22 }
  0x2d   : > { %v368_v13 = vadd.s32 %v367_v9, %v363_v8 }
  0x2f   : > { %vm369_vm2 = vcmp.lt.s32.totalorder %v368_v13, 8 }
  0x33   : > { %v531_v23 = vpop.eup %530 }
  0x34   : > { %v533_v24 = vpop.eup %532  ;;  %v310_v25 = vadd.f32 1.0, %v531_v23 }
  0x35   : > { %v535_v26 = vpop.eup %534  ;;  %v311_v27 = vadd.f32 1.0, %v533_v24 }
  0x36   : > { %v537_v28 = vpop.eup %536  ;;  %v312_v29 = vadd.f32 1.0, %v535_v26  ;;  %540 = vrcp.f32 %v310_v25  ;;  %v381_v25 = vld [vmem:[#allocation2] sm:$0x1] }
  0x37   : > { %v313_v30 = vadd.f32 1.0, %v537_v28  ;;  %542 = vrcp.f32 %v311_v27 }
  0x38   : > { %544 = vrcp.f32 %v312_v29 }
  0x39   : > { %546 = vrcp.f32 %v313_v30  ;;  %v539_v31 = vpop.eup %538 }
  0x3a   : > { %v355_v38 = vadd.f32 1.0, %v539_v31 }
  0x3c   : > { %548 = vlog2.f32 %v355_v38 }
  0x43   : > { %v541_v36 = vpop.eup %540 }
  0x44   : > { %v543_v37 = vpop.eup %542 }
  0x45   : > { %v545_v39 = vpop.eup %544 }
  0x46   : > { %v547_v42 = vpop.eup %546  ;;  %v322_v43 = vsub.f32 %v545_v39, %v541_v36  ;;  %v330_v44 = vmin.f32 %v545_v39, %v541_v36  ;;  %v332_v45 = vmax.f32 %v545_v39, %v541_v36 }
  0x47   : > { %v324_v46 = vsub.f32 %v547_v42, %v543_v37  ;;  %v334_v47 = vmin.f32 %v543_v37, %v547_v42  ;;  %v336_v48 = vmax.f32 %v543_v37, %v547_v42 }
  0x48   : > { %v323_v49 = vand.u32 2147483647, %v322_v43  ;;  %v331_v50 = vmax.f32 %v330_v44, %v294_v32  ;;  %v333_v51 = vmin.f32 %v332_v45, %v296_v34 }
  0x49   : > { %v325_v52 = vand.u32 2147483647, %v324_v46  ;;  %v335_v54 = vmax.f32 %v334_v47, %v295_v33  ;;  %v337_v55 = vmin.f32 %v336_v48, %v297_v35  ;;  %v549_v4 = vpop.eup %548 }
  0x4a   : > { %v338_v56 = vsub.f32 %v333_v51, %v331_v50  ;;  %v357_v7 = vmul.f32 0.6931472, %v549_v4 }
  0x4b   : > { %v326_v57 = vmul.f32 %v325_v52, %v323_v49  ;;  %v339_v58 = vsub.f32 %v337_v55, %v335_v54 }
  0x4c   : > { %v358_v10 = vadd.f32 %v357_v7, %v350_v6 }
  0x4d   : > { %v340_v59 = vmul.f32 %v339_v58, %v338_v56  ;;  %v341_v60 = vadd.f32 %v329_v53, %v326_v57 }
  0x4e   : > { %v370_v14 = vmul.f32 0.2, %v358_v10 }
  0x4f   : > { %v342_v61 = vsub.f32 %v341_v60, %v340_v59  ;;  %vm343_vm1 = vcmp.lt.f32.partialorder %v340_v59, 0.0 }
  0x51   : > { %550 = vrcp.f32 %v342_v61 }
  0x5e   : > { %v551_v11 = vpop.eup %550 }
  0x5f   : > { %v345_v12 = vmul.f32 %v551_v11, %v340_v59 }
  0x61   : > { %v346_v15 = vsel %vm343_vm1, 0.0, %v345_v12 }
  0x62   : > { %v347_v17 = vsub.f32 1.0, %v346_v15 }
  0x64   : > { %v371_v18 = vadd.f32 %v370_v14, %v347_v17 }
  0x66   : > { %v372_v16 = vsel %vm369_vm2, %v371_v18, 0.0 }
  0x67   : > { %373 = vadd.xlane.f32.xlu0 %v372_v16 }
  0xf0   : > { %v374_v19 = vpop.xlane.xlu0 %373 }
  0xf1   : > { %v375_v20 = vrot.slane %v374_v19, 4 }
  0xf3   : > { %v376_v21 = vadd.f32 %v375_v20, %v374_v19 }
  0xf5   : > { %v377_v22 = vrot.slane %v376_v21, 2 }
  0xf7   : > { %v378_v23 = vadd.f32 %v377_v22, %v376_v21 }
  0xf9   : > { %v379_v24 = vrot.slane %v378_v23, 1 }
  0xfb   : > { %v380_v26 = vadd.f32 %v379_v24, %v378_v23 }
  0xfd   : > { %v382_v27 = vadd.f32 %v381_v25, %v380_v26 }
  0xff   : > { %384 = vst.msk [vmem:[#allocation2] sm:$0x1] %vm286_vm0, %v382_v27 }
 0x106   : > { %v388_v28 = vld [vmem:[#allocation2] sm:$0x1] }
 0x107   : > { %v389_v29 = vmul.f32 0.125, %v388_v28 }
 0x109   : > { %390 = vst.msk [vmem:[%s281_s17] sm:$0x1] %vm286_vm0, %v389_v29 }
 0x10a PF: > { %s12_s13 = sadd.s32 1, %s590_s13   ;;  %s711_s9 = smov %s578_s10 }
 0x10b   : > { %p9_p10 = scmp.ge.s32.totalorder %s12_s13, 4   ;;  %s712_s10 = smov %s647_s18 }
 0x10c   : > { %s713_s11 = smov %s586_s12  ;;  %s714_s12 = smov %s716_s14 }
 0x10d   :  { %11 = sbr.rel (!%p9_p10) target bundleno = 3 (0x3), region = 155 }

</bundles_post_ra>
